<compile_context>
chip_gen: v7x
topology: tpu7x:2x2x1
jax: 0.10.0
libtpu: 0.0.40
codegen_flags: <defaults>
</compile_context>

<pallas_src>
import functools

import jax
import jax.numpy as jnp
from jax import lax
from jax.experimental import pallas as pl
from jax.experimental.pallas import tpu as pltpu

BN_EPS = 1e-5


def _round_up(n, m):
    return ((n + m - 1) // m) * m


def _mlp_kernel(x_ref, w1_ref, b1_ref, w2_ref, b2_ref, w3_ref, b3_ref,
                w4_ref, b4_ref, out_ref):
    # x_ref: (bt, D) f32 tile with the batch on sublanes (natural HBM layout of x).
    xb = x_ref[...].astype(w1_ref.dtype)

    # --- block 1: (BN-folded) Linear(D, 128) + ReLU  (Dropout = identity in eval) ---
    # Contract the minor dims of both operands (q @ k^T pattern): (128, D)x(bt, D)
    # -> (128, bt), putting the batch on the lane axis for the rest of the network.
    h = lax.dot_general(w1_ref[...], xb, (((1,), (1,)), ((), ())),
                        preferred_element_type=jnp.float32) + b1_ref[...]
    h = jnp.maximum(h, 0.0)

    # --- block 2: (BN-folded) Linear(128, 64) + ReLU ---
    h = jnp.dot(w2_ref[...], h.astype(w2_ref.dtype),
                preferred_element_type=jnp.float32) + b2_ref[...]
    h = jnp.maximum(h, 0.0)

    # --- block 3: (BN-folded) Linear(64, 32) + ReLU ---
    h = jnp.dot(w3_ref[...], h.astype(w3_ref.dtype),
                preferred_element_type=jnp.float32) + b3_ref[...]
    h = jnp.maximum(h, 0.0)

    # --- head: Linear(32, 1) as VPU multiply + sublane reduction, then sigmoid ---
    # w4_ref is a (32, 1) f32 column; broadcast along lanes, reduce the 32 sublanes.
    z = jnp.sum(w4_ref[...] * h, axis=0, keepdims=True) + b4_ref[...]   # (1, bt)
    out_ref[...] = 1.0 / (1.0 + jnp.exp(-z))


@functools.partial(jax.jit, static_argnames=("batch_tile", "use_bf16"))
def logistic_regression_forward(x, kernel_params, *, batch_tile=2048, use_bf16=True):
    """x: (B, D) float32.  kernel_params: output of fold_bn_params().  Returns (B, 1) f32."""
    B, D = x.shape
    w1, b1, w2, b2, w3, b3, w4c, b4 = kernel_params
    compute_dtype = jnp.bfloat16 if use_bf16 else jnp.float32

    # Lane-dim batch tile: multiple of 128, clamped to the (128-padded) batch.
    bt = min(_round_up(batch_tile, 128), _round_up(B, 128))
    b_pad = _round_up(B, bt)
    num_tiles = b_pad // bt

    # Only layout plumbing left in XLA: pad the batch to a tile multiple when needed.
    xp = x if b_pad == B else jnp.pad(x, ((0, b_pad - B), (0, 0)))

    # Matmul weights in compute dtype (tiny); biases / head stay f32 for the epilogue.
    w1c = w1.astype(compute_dtype)
    w2c = w2.astype(compute_dtype)
    w3c = w3.astype(compute_dtype)
    args = (xp, w1c, b1, w2c, b2, w3c, b3, w4c, b4)

    def _full(shape):
        return pl.BlockSpec(shape, lambda i: (0,) * len(shape))

    in_specs = [pl.BlockSpec((bt, D), lambda i: (i, 0))]
    in_specs += [_full(a.shape) for a in args[1:]]

    out = pl.pallas_call(
        _mlp_kernel,
        out_shape=jax.ShapeDtypeStruct((1, b_pad), jnp.float32),
        grid_spec=pltpu.PrefetchScalarGridSpec(
            num_scalar_prefetch=0,
            grid=(num_tiles,),
            in_specs=in_specs,
            out_specs=pl.BlockSpec((1, bt), lambda i: (0, i)),
        ),
        compiler_params=pltpu.CompilerParams(
            dimension_semantics=("parallel",),
        ),
    )(*args)

    return out[0, :B].reshape(B, 1)


def init_params(key, input_dim):
    """Deterministic init mirroring the PyTorch module's __init__ (PyTorch layouts)."""
    dims = [(input_dim, 128), (128, 64), (64, 32), (32, 1)]
    keys = jax.random.split(key, len(dims))
    layers = []
    for (fan_in, fan_out), k in zip(dims, keys):
        # kaiming_normal_, mode='fan_in', nonlinearity='relu' -> std = sqrt(2/fan_in)
        std = (2.0 / fan_in) ** 0.5
        w = jax.random.normal(k, (fan_out, fan_in), dtype=jnp.float32) * std  # (out, in)
        b = jnp.zeros((fan_out,), dtype=jnp.float32)
        layers.append((w, b))

    def bn(f):
        gamma = jnp.ones((f,), jnp.float32)
        beta = jnp.zeros((f,), jnp.float32)
        running_mean = jnp.zeros((f,), jnp.float32)
        running_var = jnp.ones((f,), jnp.float32)
        return gamma, beta, running_mean, running_var

    (w1, b1), (w2, b2), (w3, b3), (w4, b4) = layers
    return ((w1, b1) + bn(128), (w2, b2) + bn(64), (w3, b3) + bn(32), (w4, b4))


def fold_bn_params(params):
    """One-time parameter prep: fold eval-mode BatchNorm into the preceding Linear."""
    (w1, b1, g1, be1, m1, v1), (w2, b2, g2, be2, m2, v2), \
        (w3, b3, g3, be3, m3, v3), (w4, b4) = params

    def fold(w, b, g, be, m, v):
        s = g * jax.lax.rsqrt(v + BN_EPS)
        wf = w * s[:, None]                        # (out, in)
        bf = ((b - m) * s + be)[:, None]           # (out, 1) column -> lane broadcast
        return wf, bf

    w1f, b1f = fold(w1, b1, g1, be1, m1, v1)
    w2f, b2f = fold(w2, b2, g2, be2, m2, v2)
    w3f, b3f = fold(w3, b3, g3, be3, m3, v3)
    w4c = jnp.asarray(w4).T                        # (32, 1) head weights as a column
    b4c = jnp.asarray(b4).reshape(1, 1)            # (1, 1)
    return (w1f, b1f, w2f, b2f, w3f, b3f, w4c, b4c)


def reference_forward(x, params):
    """Pure-JAX eval-mode reference with UNfolded BatchNorm (validates the fold)."""
    (w1, b1, g1, be1, m1, v1), (w2, b2, g2, be2, m2, v2), \
        (w3, b3, g3, be3, m3, v3), (w4, b4) = params

    def block(h, w, b, g, be, m, v):
        h = h @ w.T + b
        h = g * (h - m) / jnp.sqrt(v + BN_EPS) + be
        return jnp.maximum(h, 0.0)

    h = block(x, w1, b1, g1, be1, m1, v1)
    h = block(h, w2, b2, g2, be2, m2, v2)
    h = block(h, w3, b3, g3, be3, m3, v3)
    z = h @ w4.T + b4
    return jax.nn.sigmoid(z)


if __name__ == "__main__":
    input_dim = 32
    batch = 16

    key = jax.random.PRNGKey(0)
    k_params, k_x = jax.random.split(key)

    params = init_params(k_params, input_dim)
    x = jax.random.normal(k_x, (batch, input_dim), dtype=jnp.float32)

    kernel_params = fold_bn_params(params)
    ref = reference_forward(x, params)

    # f32 path (exact eval semantics, validates the BN fold + transposed layout).
    out = logistic_regression_forward(x, kernel_params, use_bf16=False)
    out = jax.block_until_ready(out)
    assert out.shape == (batch, 1), out.shape
    assert jnp.allclose(out, ref, atol=1e-4, rtol=1e-4), float(jnp.max(jnp.abs(out - ref)))

    # bf16 matmul operands + f32 accumulation/epilogue (fast path on v6e/v7x).
    out_bf16 = logistic_regression_forward(x, kernel_params, use_bf16=True)
    out_bf16 = jax.block_until_ready(out_bf16)
    assert out_bf16.shape == (batch, 1), out_bf16.shape
    assert jnp.allclose(out_bf16, ref, atol=2e-2), float(jnp.max(jnp.abs(out_bf16 - ref)))

    print("KERNEL_OK")
</pallas_src>

<mosaic_0001>
module attributes {stable_mosaic.version = 11 : i64} {
  func.func @_mlp_kernel(%arg0: i32, %arg1: memref<128x32xf32, #tpu.memory_space<vmem>>, %arg2: memref<128x32xf32, #tpu.memory_space<vmem>>, %arg3: memref<128x1xf32, #tpu.memory_space<vmem>>, %arg4: memref<64x128xf32, #tpu.memory_space<vmem>>, %arg5: memref<64x1xf32, #tpu.memory_space<vmem>>, %arg6: memref<32x64xf32, #tpu.memory_space<vmem>>, %arg7: memref<32x1xf32, #tpu.memory_space<vmem>>, %arg8: memref<32x1xf32, #tpu.memory_space<vmem>>, %arg9: memref<1x1xf32, #tpu.memory_space<vmem>>, %arg10: memref<1x128xf32, #tpu.memory_space<vmem>>) attributes {dimension_semantics = [#tpu.dimension_semantics<parallel>], iteration_bounds = array<i64: 1>, scalar_prefetch = 0 : i64, scratch_operands = 0 : i64, tpu.core_type = #tpu.core_type<tc>, window_params = [{transform_indices = @transform_0, window_bounds = array<i64: 128, 32>}, {pipeline_mode = #tpu.pipeline_mode<synchronous>, transform_indices = @transform_1, window_bounds = array<i64: 128, 32>}, {pipeline_mode = #tpu.pipeline_mode<synchronous>, transform_indices = @transform_2, window_bounds = array<i64: 128, 1>}, {pipeline_mode = #tpu.pipeline_mode<synchronous>, transform_indices = @transform_3, window_bounds = array<i64: 64, 128>}, {pipeline_mode = #tpu.pipeline_mode<synchronous>, transform_indices = @transform_4, window_bounds = array<i64: 64, 1>}, {pipeline_mode = #tpu.pipeline_mode<synchronous>, transform_indices = @transform_5, window_bounds = array<i64: 32, 64>}, {pipeline_mode = #tpu.pipeline_mode<synchronous>, transform_indices = @transform_6, window_bounds = array<i64: 32, 1>}, {pipeline_mode = #tpu.pipeline_mode<synchronous>, transform_indices = @transform_7, window_bounds = array<i64: 32, 1>}, {pipeline_mode = #tpu.pipeline_mode<synchronous>, transform_indices = @transform_8, window_bounds = array<i64: 1, 1>}, {transform_indices = @transform_9, window_bounds = array<i64: 1, 128>}]} {
    %c0 = arith.constant 0 : index
    %c0_0 = arith.constant 0 : index
    %0 = vector.load %arg1[%c0, %c0_0] : memref<128x32xf32, #tpu.memory_space<vmem>>, vector<128x32xf32>
    %c0_1 = arith.constant 0 : index
    %c0_2 = arith.constant 0 : index
    %1 = vector.load %arg2[%c0_1, %c0_2] : memref<128x32xf32, #tpu.memory_space<vmem>>, vector<128x32xf32>
    %cst = arith.constant dense<0.000000e+00> : vector<128x128xf32>
    %2 = tpu.matmul %1, %0, %cst {dimension_numbers = #tpu.dot_dimension_numbers<[1], [1], [0], [0], [0, 0, 1, 0], [], []>} : vector<128x32xf32>, vector<128x32xf32>, vector<128x128xf32> -> vector<128x128xf32>
    %c0_3 = arith.constant 0 : index
    %c0_4 = arith.constant 0 : index
    %3 = vector.load %arg3[%c0_3, %c0_4] : memref<128x1xf32, #tpu.memory_space<vmem>>, vector<128x1xf32>
    %4 = vector.broadcast %3 : vector<128x1xf32> to vector<128x128xf32>
    %5 = arith.addf %2, %4 : vector<128x128xf32>
    %cst_5 = arith.constant 0.000000e+00 : f32
    %6 = vector.broadcast %cst_5 : f32 to vector<128x128xf32>
    %7 = arith.maximumf %5, %6 : vector<128x128xf32>
    %c0_6 = arith.constant 0 : index
    %c0_7 = arith.constant 0 : index
    %8 = vector.load %arg4[%c0_6, %c0_7] : memref<64x128xf32, #tpu.memory_space<vmem>>, vector<64x128xf32>
    %cst_8 = arith.constant dense<0.000000e+00> : vector<64x128xf32>
    %9 = tpu.matmul %8, %7, %cst_8 {dimension_numbers = #tpu.dot_dimension_numbers<[1], [0], [0], [1], [0, 0, 1, 1], [], []>} : vector<64x128xf32>, vector<128x128xf32>, vector<64x128xf32> -> vector<64x128xf32>
    %c0_9 = arith.constant 0 : index
    %c0_10 = arith.constant 0 : index
    %10 = vector.load %arg5[%c0_9, %c0_10] : memref<64x1xf32, #tpu.memory_space<vmem>>, vector<64x1xf32>
    %11 = vector.broadcast %10 : vector<64x1xf32> to vector<64x128xf32>
    %12 = arith.addf %9, %11 : vector<64x128xf32>
    %cst_11 = arith.constant 0.000000e+00 : f32
    %13 = vector.broadcast %cst_11 : f32 to vector<64x128xf32>
    %14 = arith.maximumf %12, %13 : vector<64x128xf32>
    %c0_12 = arith.constant 0 : index
    %c0_13 = arith.constant 0 : index
    %15 = vector.load %arg6[%c0_12, %c0_13] : memref<32x64xf32, #tpu.memory_space<vmem>>, vector<32x64xf32>
    %cst_14 = arith.constant dense<0.000000e+00> : vector<32x128xf32>
    %16 = tpu.matmul %15, %14, %cst_14 {dimension_numbers = #tpu.dot_dimension_numbers<[1], [0], [0], [1], [0, 0, 1, 1], [], []>} : vector<32x64xf32>, vector<64x128xf32>, vector<32x128xf32> -> vector<32x128xf32>
    %c0_15 = arith.constant 0 : index
    %c0_16 = arith.constant 0 : index
    %17 = vector.load %arg7[%c0_15, %c0_16] : memref<32x1xf32, #tpu.memory_space<vmem>>, vector<32x1xf32>
    %18 = vector.broadcast %17 : vector<32x1xf32> to vector<32x128xf32>
    %19 = arith.addf %16, %18 : vector<32x128xf32>
    %cst_17 = arith.constant 0.000000e+00 : f32
    %20 = vector.broadcast %cst_17 : f32 to vector<32x128xf32>
    %21 = arith.maximumf %19, %20 : vector<32x128xf32>
    %c0_18 = arith.constant 0 : index
    %c0_19 = arith.constant 0 : index
    %22 = vector.load %arg8[%c0_18, %c0_19] : memref<32x1xf32, #tpu.memory_space<vmem>>, vector<32x1xf32>
    %23 = vector.broadcast %22 : vector<32x1xf32> to vector<32x128xf32>
    %24 = arith.mulf %23, %21 : vector<32x128xf32>
    %cst_20 = arith.constant dense<0.000000e+00> : vector<128xf32>
    %25 = vector.multi_reduction <add>, %24, %cst_20 [0] : vector<32x128xf32> to vector<128xf32>
    %26 = vector.shape_cast %25 : vector<128xf32> to vector<1x128xf32>
    %c0_21 = arith.constant 0 : index
    %c0_22 = arith.constant 0 : index
    %27 = vector.load %arg9[%c0_21, %c0_22] : memref<1x1xf32, #tpu.memory_space<vmem>>, vector<1x1xf32>
    %28 = vector.broadcast %27 : vector<1x1xf32> to vector<1x128xf32>
    %29 = arith.addf %26, %28 : vector<1x128xf32>
    %cst_23 = arith.constant 0.000000e+00 : f32
    %30 = vector.broadcast %cst_23 : f32 to vector<1x128xf32>
    %31 = arith.subf %30, %29 : vector<1x128xf32>
    %32 = math.exp %31 : vector<1x128xf32>
    %cst_24 = arith.constant 1.000000e+00 : f32
    %33 = vector.broadcast %cst_24 : f32 to vector<1x128xf32>
    %34 = arith.addf %33, %32 : vector<1x128xf32>
    %cst_25 = arith.constant 1.000000e+00 : f32
    %35 = vector.broadcast %cst_25 : f32 to vector<1x128xf32>
    %36 = arith.divf %35, %34 : vector<1x128xf32>
    %c0_26 = arith.constant 0 : index
    %c0_27 = arith.constant 0 : index
    %37 = vector.load %arg10[%c0_26, %c0_27] : memref<1x128xf32, #tpu.memory_space<vmem>>, vector<1x128xf32>
    tpu.vector_store %arg10[%c0_26, %c0_27], %36 {strides = array<i32>} : memref<1x128xf32, #tpu.memory_space<vmem>>, vector<1x128xf32>,
    return
  }
  func.func @transform_0(%arg0: i32) -> (i32, i32) {
    %c0_i32 = arith.constant 0 : i32
    %c0_i32_0 = arith.constant 0 : i32
    return %arg0, %c0_i32 : i32, i32
  }
  func.func @transform_1(%arg0: i32) -> (i32, i32) {
    %c0_i32 = arith.constant 0 : i32
    %c0_i32_0 = arith.constant 0 : i32
    %c0_i32_1 = arith.constant 0 : i32
    return %c0_i32, %c0_i32_0 : i32, i32
  }
  func.func @transform_2(%arg0: i32) -> (i32, i32) {
    %c0_i32 = arith.constant 0 : i32
    %c0_i32_0 = arith.constant 0 : i32
    %c0_i32_1 = arith.constant 0 : i32
    return %c0_i32, %c0_i32_0 : i32, i32
  }
  func.func @transform_3(%arg0: i32) -> (i32, i32) {
    %c0_i32 = arith.constant 0 : i32
    %c0_i32_0 = arith.constant 0 : i32
    %c0_i32_1 = arith.constant 0 : i32
    return %c0_i32, %c0_i32_0 : i32, i32
  }
  func.func @transform_4(%arg0: i32) -> (i32, i32) {
    %c0_i32 = arith.constant 0 : i32
    %c0_i32_0 = arith.constant 0 : i32
    %c0_i32_1 = arith.constant 0 : i32
    return %c0_i32, %c0_i32_0 : i32, i32
  }
  func.func @transform_5(%arg0: i32) -> (i32, i32) {
    %c0_i32 = arith.constant 0 : i32
    %c0_i32_0 = arith.constant 0 : i32
    %c0_i32_1 = arith.constant 0 : i32
    return %c0_i32, %c0_i32_0 : i32, i32
  }
  func.func @transform_6(%arg0: i32) -> (i32, i32) {
    %c0_i32 = arith.constant 0 : i32
    %c0_i32_0 = arith.constant 0 : i32
    %c0_i32_1 = arith.constant 0 : i32
    return %c0_i32, %c0_i32_0 : i32, i32
  }
  func.func @transform_7(%arg0: i32) -> (i32, i32) {
    %c0_i32 = arith.constant 0 : i32
    %c0_i32_0 = arith.constant 0 : i32
    %c0_i32_1 = arith.constant 0 : i32
    return %c0_i32, %c0_i32_0 : i32, i32
  }
  func.func @transform_8(%arg0: i32) -> (i32, i32) {
    %c0_i32 = arith.constant 0 : i32
    %c0_i32_0 = arith.constant 0 : i32
    %c0_i32_1 = arith.constant 0 : i32
    return %c0_i32, %c0_i32_0 : i32, i32
  }
  func.func @transform_9(%arg0: i32) -> (i32, i32) {
    %c0_i32 = arith.constant 0 : i32
    %c0_i32_0 = arith.constant 0 : i32
    return %c0_i32, %arg0 : i32, i32
  }
}

</mosaic_0001>

<bundles_post_ra>
// kernel: logistic_regression_forward.1
= control target key start
LH: loop header
LB: loop body
LE: loop exit
PB: predicated region body
PF: predicated region fallthrough
CT: control target
= control target key end

     0   :  { %vm162_vm0 = vcmask 261120   ;;  %v1107_v3 = vmov 0   ;;  %vm617_vm2 = vcmask 523264   ;;  %s1450_s0 = inlined_call_operand.vmem [shape: f32[128,32], index: 0, kind: input, shape index: {}]   ;;  %s1451_s8 = inlined_call_operand.<no memory space> [shape: f32[1,1], index: 8, kind: input, shape index: {}]   ;;  %s1452_s1 = inlined_call_operand.vmem [shape: f32[128,32], index: 1, kind: input, shape index: {}]   ;;  %s1453_s2 = inlined_call_operand.vmem [shape: f32[128,1], index: 2, kind: input, shape index: {}]   ;;  %s1454_s4 = inlined_call_operand.vmem [shape: f32[64,1], index: 4, kind: input, shape index: {}]   ;;  %s1455_s6 = inlined_call_operand.vmem [shape: f32[32,1], index: 6, kind: input, shape index: {}]   ;;  %s1456_s7 = inlined_call_operand.vmem [shape: f32[32,1], index: 7, kind: input, shape index: {}]   ;;  %s1457_s3 = inlined_call_operand.vmem [shape: f32[64,128], index: 3, kind: input, shape index: {}]   ;;  %s1458_s5 = inlined_call_operand.vmem [shape: f32[32,64], index: 5, kind: input, shape index: {}]   ;;  %s1459_s9 = inlined_call_operand.vmem [shape: f32[1,128], index: 9, kind: output, shape index: {}]  }
   0x1   :  { %v34_v0 = vld [vmem:[%s1450_s0] sm:$0xff]  ;;  %v35_v1 = vld [vmem:[%s1450_s0 + $0x8] sm:$0xff]  ;;  %vm1166_vm1 = vmpackc.low %vm162_vm0, %vm162_vm0  ;;  %1101 = vset.pattern.permute.xlu0 %v1107_v3  ;;  %1102 = vset.pattern.permute.xlu1 %v1107_v3  ;;  %v14_v4 = vstv %s1451_s8 }
   0x2   :  { %v1004_v5 = vpack.c.bf16 %v35_v1, %v34_v0  ;;  %v36_v6 = vld [vmem:[%s1450_s0 + $0x10] sm:$0xff]  ;;  %v37_v7 = vld [vmem:[%s1450_s0 + $0x18] sm:$0xff]  ;;  %15 = vst [vmem:[#allocation2] sm:$0x1] %v14_v4  ;;  %v50_v9 = vld [vmem:[%s1452_s1] sm:$0xff] }
   0x3   :  { %v1010_v8 = vpack.c.bf16 %v37_v7, %v36_v6  ;;  %v38_v10 = vld [vmem:[%s1450_s0 + $0x20] sm:$0xff]  ;;  %v39_v11 = vld [vmem:[%s1450_s0 + $0x28] sm:$0xff]  ;;  %914 = vmatprep.mubr.msk.f32.mxu0 %vm162_vm0, %v50_v9  ;;  %v68_v15 = vld [vmem:[%s1453_s2 + $0x10] sm:$0xff] }
   0x4   :  { %1006 = vmatprep.subr.msk.bf16.mxu0 %vm1166_vm1, %v1004_v5  ;;  %v1016_v12 = vpack.c.bf16 %v39_v11, %v38_v10  ;;  %v66_v13 = vld [vmem:[%s1453_s2] sm:$0xff]  ;;  %v67_v14 = vld [vmem:[%s1453_s2 + $0x8] sm:$0xff]  ;;  %94 = vperm.xlu1 %1102, %v68_v15   ;;  %v69_v16 = vld [vmem:[%s1453_s2 + $0x18] sm:$0xff] }
   0x5   :  { %1009 = vmatpush3.bf16.xpose.msk.msra.mxu0 %vm1166_vm1, %v1004_v5  ;;  %84 = vperm.xlu0 %1101, %v66_v13   ;;  %v40_v17 = vld [vmem:[%s1450_s0 + $0x30] sm:$0xff]  ;;  %v41_v18 = vld [vmem:[%s1450_s0 + $0x38] sm:$0xff]  ;;  %v70_v19 = vld [vmem:[%s1453_s2 + $0x20] sm:$0xff] }
   0x6   :  { %1012 = vmatprep.subr.msk.bf16.mxu0 %vm1166_vm1, %v1010_v8  ;;  %v1022_v20 = vpack.c.bf16 %v41_v18, %v40_v17  ;;  %v71_v21 = vld [vmem:[%s1453_s2 + $0x28] sm:$0xff]  ;;  %v72_v22 = vld [vmem:[%s1453_s2 + $0x30] sm:$0xff]  ;;  %v73_v23 = vld [vmem:[%s1453_s2 + $0x38] sm:$0xff] }
   0x7   :  { %v42_v24 = vld [vmem:[%s1450_s0 + $0x40] sm:$0xff]  ;;  %v43_v25 = vld [vmem:[%s1450_s0 + $0x48] sm:$0xff]  ;;  %v76_v29 = vld [vmem:[%s1453_s2 + $0x50] sm:$0xff] }
   0x8   :  { %99 = vperm.xlu1 %1102, %v69_v16   ;;  %v74_v26 = vld [vmem:[%s1453_s2 + $0x40] sm:$0xff]  ;;  %v1028_v27 = vpack.c.bf16 %v43_v25, %v42_v24  ;;  %v75_v28 = vld [vmem:[%s1453_s2 + $0x48] sm:$0xff]  ;;  %v77_v30 = vld [vmem:[%s1453_s2 + $0x58] sm:$0xff] }
   0x9   :  { %89 = vperm.xlu0 %1101, %v67_v14   ;;  %v44_v31 = vld [vmem:[%s1450_s0 + $0x50] sm:$0xff]  ;;  %v45_v32 = vld [vmem:[%s1450_s0 + $0x58] sm:$0xff]  ;;  %v78_v33 = vld [vmem:[%s1453_s2 + $0x60] sm:$0xff] }
   0xa   :  { %v1034_v34 = vpack.c.bf16 %v45_v32, %v44_v31  ;;  %v79_v35 = vld [vmem:[%s1453_s2 + $0x68] sm:$0xff]  ;;  %v80_v36 = vld [vmem:[%s1453_s2 + $0x70] sm:$0xff]  ;;  %v81_v37 = vld [vmem:[%s1453_s2 + $0x78] sm:$0xff] }
   0xb   :  { %v46_v38 = vld [vmem:[%s1450_s0 + $0x60] sm:$0xff]  ;;  %v47_v39 = vld [vmem:[%s1450_s0 + $0x68] sm:$0xff]  ;;  %v430_v43 = vld [vmem:[%s1454_s4 + $0x10] sm:$0xff] }
   0xc   :  { %109 = vperm.xlu1 %1102, %v71_v21   ;;  %v428_v40 = vld [vmem:[%s1454_s4] sm:$0xff]  ;;  %v1040_v41 = vpack.c.bf16 %v47_v39, %v46_v38  ;;  %v429_v42 = vld [vmem:[%s1454_s4 + $0x8] sm:$0xff]  ;;  %v431_v44 = vld [vmem:[%s1454_s4 + $0x18] sm:$0xff] }
   0xd   :  { %1015 = vmatpush3.bf16.xpose.msk.msra.mxu0 %vm1166_vm1, %v1010_v8  ;;  %104 = vperm.xlu0 %1101, %v70_v19   ;;  %v48_v45 = vld [vmem:[%s1450_s0 + $0x70] sm:$0xff]  ;;  %v49_v46 = vld [vmem:[%s1450_s0 + $0x78] sm:$0xff]  ;;  %v432_v47 = vld [vmem:[%s1454_s4 + $0x20] sm:$0xff] }
   0xe   :  { %1018 = vmatprep.subr.msk.bf16.mxu0 %vm1166_vm1, %v1016_v12  ;;  %v1046_v48 = vpack.c.bf16 %v49_v46, %v48_v45  ;;  %v433_v49 = vld [vmem:[%s1454_s4 + $0x28] sm:$0xff]  ;;  %v434_v50 = vld [vmem:[%s1454_s4 + $0x30] sm:$0xff]  ;;  %v435_v51 = vld [vmem:[%s1454_s4 + $0x38] sm:$0xff] }
   0xf   :  { %v593_v52 = vld [vmem:[%s1455_s6] sm:$0xff]  ;;  %v594_v53 = vld [vmem:[%s1455_s6 + $0x8] sm:$0xff]  ;;  %v595_v54 = vld [vmem:[%s1455_s6 + $0x10] sm:$0xff] }
  0x10   :  { %119 = vperm.xlu1 %1102, %v73_v23   ;;  %v596_v55 = vld [vmem:[%s1455_s6 + $0x18] sm:$0xff]  ;;  %v719_v56 = vld [vmem:[%s1456_s7] sm:$0xff]  ;;  %v51_v57 = vld [vmem:[%s1452_s1 + $0x8] sm:$0xff] }
  0x11   :  { %114 = vperm.xlu0 %1101, %v72_v22   ;;  %v52_v58 = vld [vmem:[%s1452_s1 + $0x10] sm:$0xff]  ;;  %v720_v59 = vld [vmem:[%s1456_s7 + $0x8] sm:$0xff]  ;;  %v53_v61 = vld [vmem:[%s1452_s1 + $0x18] sm:$0xff] }
  0x12   :  { %v721_v60 = vld [vmem:[%s1456_s7 + $0x10] sm:$0xff]  ;;  %v54_v62 = vld [vmem:[%s1452_s1 + $0x20] sm:$0xff]  ;;  %v722_v63 = vld [vmem:[%s1456_s7 + $0x18] sm:$0xff] }
  0x13   :  { %v756_v0 = vld [vmem:[#allocation2] sm:$0x1]  ;;  %v55_v1 = vld [vmem:[%s1452_s1 + $0x28] sm:$0xff]  ;;  %v56_v2 = vld [vmem:[%s1452_s1 + $0x30] sm:$0xff] }
  0x14   :  { %129 = vperm.xlu1 %1102, %v75_v28   ;;  %v57_v3 = vld [vmem:[%s1452_s1 + $0x38] sm:$0xff]  ;;  %v58_v4 = vld [vmem:[%s1452_s1 + $0x40] sm:$0xff]  ;;  %v59_v5 = vld [vmem:[%s1452_s1 + $0x48] sm:$0xff] }
  0x15   :  { %1021 = vmatpush3.bf16.xpose.msk.msra.mxu0 %vm1166_vm1, %v1016_v12  ;;  %124 = vperm.xlu0 %1101, %v74_v26   ;;  %v60_v6 = vld [vmem:[%s1452_s1 + $0x50] sm:$0xff]  ;;  %v61_v7 = vld [vmem:[%s1452_s1 + $0x58] sm:$0xff]  ;;  %v62_v8 = vld [vmem:[%s1452_s1 + $0x60] sm:$0xff] }
  0x16   :  { %1024 = vmatprep.subr.msk.bf16.mxu0 %vm1166_vm1, %v1022_v20  ;;  %v63_v9 = vld [vmem:[%s1452_s1 + $0x68] sm:$0xff]  ;;  %v64_v10 = vld [vmem:[%s1452_s1 + $0x70] sm:$0xff]  ;;  %v65_v11 = vld [vmem:[%s1452_s1 + $0x78] sm:$0xff] }
  0x17   :  { %v420_v12 = vld [vmem:[%s1457_s3] sm:$0xff] }
  0x18   :  { %139 = vperm.xlu1 %1102, %v77_v30   ;;  %970 = vmatprep.mubr.f32.mxu1 %v420_v12 }
  0x19   :  { %134 = vperm.xlu0 %1101, %v76_v29  }
  0x1c   :  { %149 = vperm.xlu1 %1102, %v79_v35  }
  0x1d   :  { %1027 = vmatpush3.bf16.xpose.msk.msra.mxu0 %vm1166_vm1, %v1022_v20  ;;  %144 = vperm.xlu0 %1101, %v78_v33  }
  0x1e   :  { %1030 = vmatprep.subr.msk.bf16.mxu0 %vm1166_vm1, %v1028_v27 }
  0x20   :  { %159 = vperm.xlu1 %1102, %v81_v37  }
  0x21   :  { %154 = vperm.xlu0 %1101, %v80_v36  }
  0x24   :  { %443 = vperm.xlu1 %1102, %v429_v42  }
  0x25   :  { %1033 = vmatpush3.bf16.xpose.msk.msra.mxu0 %vm1166_vm1, %v1028_v27  ;;  %438 = vperm.xlu0 %1101, %v428_v40  }
  0x26   :  { %1036 = vmatprep.subr.msk.bf16.mxu0 %vm1166_vm1, %v1034_v34 }
  0x28   :  { %453 = vperm.xlu1 %1102, %v431_v44  }
  0x29   :  { %448 = vperm.xlu0 %1101, %v430_v43  }
  0x2c   :  { %463 = vperm.xlu1 %1102, %v433_v49  }
  0x2d   :  { %1039 = vmatpush3.bf16.xpose.msk.msra.mxu0 %vm1166_vm1, %v1034_v34  ;;  %458 = vperm.xlu0 %1101, %v432_v47  }
  0x2e   :  { %1042 = vmatprep.subr.msk.bf16.mxu0 %vm1166_vm1, %v1040_v41 }
  0x30   :  { %473 = vperm.xlu1 %1102, %v435_v51  }
  0x31   :  { %468 = vperm.xlu0 %1101, %v434_v50  }
  0x34   :  { %604 = vperm.xlu1 %1102, %v594_v53  }
  0x35   :  { %1045 = vmatpush3.bf16.xpose.msk.msra.mxu0 %vm1166_vm1, %v1040_v41  ;;  %599 = vperm.xlu0 %1101, %v593_v52  }
  0x36   :  { %1048 = vmatprep.subr.msk.bf16.mxu0 %vm1166_vm1, %v1046_v48 }
  0x38   :  { %614 = vperm.xlu1 %1102, %v596_v55  }
  0x39   :  { %609 = vperm.xlu0 %1101, %v595_v54  }
  0x3c   :  { %730 = vperm.xlu1 %1102, %v720_v59  }
  0x3d   :  { %1051 = vmatpush3.bf16.xpose.msk.msra.mxu0 %vm1166_vm1, %v1046_v48  ;;  %725 = vperm.xlu0 %1101, %v719_v56  }
  0x40   :  { %740 = vperm.xlu1 %1102, %v722_v63  }
  0x41   :  { %735 = vperm.xlu0 %1101, %v721_v60  }
  0x44   :  { %915 = vmatmul.mubr.msk.f32.vlgmr.msra.gmra.mrb[0].mxu0 %vm162_vm0, %v51_v57 }
  0x45   :  { %917 = vmatprep.mubr.msk.f32.mxu0 %vm162_vm0, %v52_v58  ;;  %759 = vperm.xlu0 %1101, %v756_v0  }
  0x48   :  { %918 = vmatmul.mubr.msk.f32.gmra.mrb[2].mxu0 %vm162_vm0, %v53_v61 }
  0x49   :  { %920 = vmatprep.mubr.msk.f32.mxu0 %vm162_vm0, %v54_v62 }
  0x4c   :  { %921 = vmatmul.mubr.msk.f32.gmra.mrb[4].mxu0 %vm162_vm0, %v55_v1 }
  0x4d   :  { %923 = vmatprep.mubr.msk.f32.mxu0 %vm162_vm0, %v56_v2 }
  0x50   :  { %924 = vmatmul.mubr.msk.f32.gmra.mrb[6].mxu0 %vm162_vm0, %v57_v3 }
  0x51   :  { %926 = vmatprep.mubr.msk.f32.mxu0 %vm162_vm0, %v58_v4 }
  0x54   :  { %927 = vmatmul.mubr.msk.f32.gmra.mrb[8].mxu0 %vm162_vm0, %v59_v5 }
  0x55   :  { %929 = vmatprep.mubr.msk.f32.mxu0 %vm162_vm0, %v60_v6 }
  0x58   :  { %930 = vmatmul.mubr.msk.f32.gmra.mrb[10].mxu0 %vm162_vm0, %v61_v7 }
  0x59   :  { %932 = vmatprep.mubr.msk.f32.mxu0 %vm162_vm0, %v62_v8 }
  0x5c   :  { %933 = vmatmul.mubr.msk.f32.gmra.mrb[12].mxu0 %vm162_vm0, %v63_v9 }
  0x5d   :  { %935 = vmatprep.mubr.msk.f32.mxu0 %vm162_vm0, %v64_v10 }
  0x60   :  { %936 = vmatmul.mubr.msk.f32.gmra.mrb[14].mxu0 %vm162_vm0, %v65_v11 }
  0x83   :  { %v95_v13 = vpop.permute.xlu1 %94 }
  0x84   :  { %v85_v14 = vpop.permute.xlu0 %84 }
  0x87   :  { %v100_v15 = vpop.permute.xlu1 %99 }
  0x88   :  { %v90_v16 = vpop.permute.xlu0 %89 }
  0x8b   :  { %v110_v17 = vpop.permute.xlu1 %109 }
  0x8c   :  { %v105_v18 = vpop.permute.xlu0 %104 }
  0x8f   :  { %v120_v24 = vpop.permute.xlu1 %119 }
  0x90   :  { %v115_v27 = vpop.permute.xlu0 %114 }
  0x93   :  { %v130_v37 = vpop.permute.xlu1 %129 }
  0x94   :  { %v125_v40 = vpop.permute.xlu0 %124 }
  0x97   :  { %v140_v49 = vpop.permute.xlu1 %139 }
  0x98   :  { %v135_v52 = vpop.permute.xlu0 %134 }
  0x9b   :  { %v150_v62 = vpop.permute.xlu1 %149 }
  0x9c   :  { %v145_v1 = vpop.permute.xlu0 %144 }
  0x9f   :  { %v160_v10 = vpop.permute.xlu1 %159 }
 0x117   :  { %v916_v19 = vpop.f32.mrb[0].mxu0 }
 0x118   :  { %v331_v20 = vadd.f32 %v916_v19, %v90_v16  ;;  %v325_v21 = vpop.f32.mrb[1].mxu0 }
 0x119   :  { %v326_v22 = vadd.f32 %v325_v21, %v85_v14  ;;  %v421_v21 = vld [vmem:[%s1457_s3 + $0x8] sm:$0xff] }
 0x11a   :  { %v405_v23 = vmax.f32 %v331_v20, 0.0 }
 0x11b   :  { %v404_v25 = vmax.f32 %v326_v22, 0.0  ;;  %v919_v26 = vpop.f32.mrb[2].mxu0  ;;  %v422_v22 = vld [vmem:[%s1457_s3 + $0x10] sm:$0xff] }
 0x11c   :  { %v341_v28 = vadd.f32 %v919_v26, %v100_v15  ;;  %v335_v29 = vpop.f32.mrb[3].mxu0  ;;  %v426_v26 = vld [vmem:[%s1457_s3 + $0x30] sm:$0xff] }
 0x11d   :  { %v336_v30 = vadd.f32 %v335_v29, %v95_v13  ;;  %v1052_v31 = vpack.c.bf16 %v405_v23, %v404_v25  ;;  %v155_v13 = vpop.permute.xlu0 %154  ;;  %v423_v23 = vld [vmem:[%s1457_s3 + $0x18] sm:$0xff]  ;;  %v425_v25 = vld [vmem:[%s1457_s3 + $0x28] sm:$0xff]  ;;  %v444_v29 = vpop.permute.xlu1 %443 }
 0x11e   :  { %v407_v32 = vmax.f32 %v341_v28, 0.0  ;;  %v589_v28 = vld [vmem:[%s1458_s5] sm:$0xff] }
 0x11f   :  { %v406_v33 = vmax.f32 %v336_v30, 0.0  ;;  %v922_v34 = vpop.f32.mrb[4].mxu0  ;;  %1053 = vmatprep.subr.bf16.mxu1 %v1052_v31 }
 0x120   :  { %v351_v35 = vadd.f32 %v922_v34, %v110_v17  ;;  %v345_v36 = vpop.f32.mrb[5].mxu0  ;;  %1055 = vmatpush3.bf16.msra.mxu1 %v1052_v31 }
 0x121   :  { %v1056_v38 = vpack.c.bf16 %v407_v32, %v406_v33  ;;  %v346_v39 = vadd.f32 %v345_v36, %v105_v18  ;;  %v439_v30 = vpop.permute.xlu0 %438  ;;  %v454_v31 = vpop.permute.xlu1 %453 }
 0x122   :  { %v409_v41 = vmax.f32 %v351_v35, 0.0 }
 0x123   :  { %v408_v42 = vmax.f32 %v346_v39, 0.0  ;;  %v925_v43 = vpop.f32.mrb[6].mxu0  ;;  %1057 = vmatprep.subr.bf16.mxu1 %v1056_v38 }
 0x124   :  { %v361_v44 = vadd.f32 %v925_v43, %v120_v24  ;;  %v355_v45 = vpop.f32.mrb[7].mxu0  ;;  %1059 = vmatpush3.bf16.msra.mxu1 %v1056_v38  ;;  %v424_v24 = vld [vmem:[%s1457_s3 + $0x20] sm:$0xff] }
 0x125   :  { %v1060_v46 = vpack.c.bf16 %v409_v41, %v408_v42  ;;  %v356_v47 = vadd.f32 %v355_v45, %v115_v27  ;;  %v427_v27 = vld [vmem:[%s1457_s3 + $0x38] sm:$0xff]  ;;  %v449_v33 = vpop.permute.xlu0 %448  ;;  %v464_v42 = vpop.permute.xlu1 %463 }
 0x126   :  { %v411_v48 = vmax.f32 %v361_v44, 0.0 }
 0x127   :  { %v410_v50 = vmax.f32 %v356_v47, 0.0  ;;  %v928_v51 = vpop.f32.mrb[8].mxu0  ;;  %1061 = vmatprep.subr.bf16.mxu1 %v1060_v46 }
 0x128   :  { %v371_v53 = vadd.f32 %v928_v51, %v130_v37  ;;  %v365_v54 = vpop.f32.mrb[9].mxu0  ;;  %1063 = vmatpush3.bf16.msra.mxu1 %v1060_v46 }
 0x129   :  { %v1064_v55 = vpack.c.bf16 %v411_v48, %v410_v50  ;;  %v366_v56 = vadd.f32 %v365_v54, %v125_v40  ;;  %v459_v45 = vpop.permute.xlu0 %458  ;;  %v474_v54 = vpop.permute.xlu1 %473 }
 0x12a   :  { %v413_v57 = vmax.f32 %v371_v53, 0.0 }
 0x12b   :  { %v412_v58 = vmax.f32 %v366_v56, 0.0  ;;  %v931_v59 = vpop.f32.mrb[10].mxu0  ;;  %1065 = vmatprep.subr.bf16.mxu1 %v1064_v55 }
 0x12c   :  { %v381_v60 = vadd.f32 %v931_v59, %v140_v49  ;;  %v375_v61 = vpop.f32.mrb[11].mxu0  ;;  %1067 = vmatpush3.bf16.msra.mxu1 %v1064_v55 }
 0x12d   :  { %v1068_v63 = vpack.c.bf16 %v413_v57, %v412_v58  ;;  %v376_v0 = vadd.f32 %v375_v61, %v135_v52  ;;  %v469_v57 = vpop.permute.xlu0 %468 }
 0x12e   :  { %v415_v2 = vmax.f32 %v381_v60, 0.0 }
 0x12f   :  { %v414_v3 = vmax.f32 %v376_v0, 0.0  ;;  %v934_v4 = vpop.f32.mrb[12].mxu0  ;;  %1069 = vmatprep.subr.bf16.mxu1 %v1068_v63 }
 0x130   :  { %v391_v5 = vadd.f32 %v934_v4, %v150_v62  ;;  %v385_v6 = vpop.f32.mrb[13].mxu0  ;;  %1071 = vmatpush3.bf16.msra.mxu1 %v1068_v63 }
 0x131   :  { %v1072_v7 = vpack.c.bf16 %v415_v2, %v414_v3  ;;  %v386_v8 = vadd.f32 %v385_v6, %v145_v1  ;;  %v590_v1 = vld [vmem:[%s1458_s5 + $0x8] sm:$0xff]  ;;  %v591_v2 = vld [vmem:[%s1458_s5 + $0x10] sm:$0xff]  ;;  %v592_v3 = vld [vmem:[%s1458_s5 + $0x18] sm:$0xff]  ;;  %v600_v4 = vpop.permute.xlu0 %599 }
 0x132   :  { %v417_v9 = vmax.f32 %v391_v5, 0.0  ;;  %v605_v5 = vpop.permute.xlu1 %604 }
 0x133   :  { %v416_v11 = vmax.f32 %v386_v8, 0.0  ;;  %v937_v12 = vpop.f32.mrb[14].mxu0  ;;  %1073 = vmatprep.subr.bf16.mxu1 %v1072_v7 }
 0x134   :  { %v401_v14 = vadd.f32 %v937_v12, %v160_v10  ;;  %v395_v15 = vpop.f32.mrb[15].mxu0  ;;  %1075 = vmatpush3.bf16.msra.mxu1 %v1072_v7 }
 0x135   :  { %v1076_v16 = vpack.c.bf16 %v417_v9, %v416_v11  ;;  %v396_v17 = vadd.f32 %v395_v15, %v155_v13  ;;  %v610_v6 = vpop.permute.xlu0 %609 }
 0x136   :  { %v419_v18 = vmax.f32 %v401_v14, 0.0  ;;  %v615_v7 = vpop.permute.xlu1 %614 }
 0x137   :  { %v418_v19 = vmax.f32 %v396_v17, 0.0  ;;  %1077 = vmatprep.subr.bf16.mxu1 %v1076_v16 }
 0x138   :  { %1079 = vmatpush3.bf16.msra.mxu1 %v1076_v16 }
 0x139   :  { %v1080_v20 = vpack.c.bf16 %v419_v18, %v418_v19  ;;  %v726_v12 = vpop.permute.xlu0 %725 }
 0x13a   :  { %v731_v14 = vpop.permute.xlu1 %730 }
 0x13b   :  { %1081 = vmatprep.subr.bf16.mxu1 %v1080_v20 }
 0x13c   :  { %1083 = vmatpush3.bf16.msra.mxu1 %v1080_v20 }
 0x13f   :  { %971 = vmatmul.mubr.f32.vlgmr.msra.gmra.mrb[0].mxu1 %v421_v21 }
 0x140   :  { %973 = vmatprep.mubr.f32.mxu1 %v422_v22 }
 0x143   :  { %974 = vmatmul.mubr.f32.gmra.mrb[2].mxu1 %v423_v23 }
 0x144   :  { %976 = vmatprep.mubr.f32.mxu1 %v424_v24 }
 0x147   :  { %977 = vmatmul.mubr.f32.gmra.mrb[4].mxu1 %v425_v25  ;;  %v736_v25 = vpop.permute.xlu0 %735 }
 0x148   :  { %979 = vmatprep.mubr.f32.mxu1 %v426_v26 }
 0x14b   :  { %980 = vmatmul.mubr.f32.gmra.mrb[6].mxu1 %v427_v27  ;;  %v741_v27 = vpop.permute.xlu1 %740 }
 0x14c   :  { %998 = vmatprep.mubr.msk.f32.mxu1 %vm617_vm2, %v589_v28 }
 0x212   :  { %v972_v32 = vpop.f32.mrb[0].mxu1 }
 0x213   :  { %v548_v34 = vadd.f32 %v972_v32, %v444_v29  ;;  %v542_v35 = vpop.f32.mrb[1].mxu1 }
 0x214   :  { %v543_v36 = vadd.f32 %v542_v35, %v439_v30  ;;  %v762_v30 = vlaneseq }
 0x215   :  { %v582_v37 = vmax.f32 %v548_v34, 0.0 }
 0x216   :  { %v581_v38 = vmax.f32 %v543_v36, 0.0  ;;  %v975_v39 = vpop.f32.mrb[2].mxu1 }
 0x217   :  { %v558_v40 = vadd.f32 %v975_v39, %v454_v31  ;;  %v552_v41 = vpop.f32.mrb[3].mxu1 }
 0x218   :  { %v1084_v43 = vpack.c.bf16 %v582_v37, %v581_v38  ;;  %v553_v44 = vadd.f32 %v552_v41, %v449_v33  ;;  %v763_v33 = vshrl.u32 %v762_v30, 7  ;;  %v760_v38 = vpop.permute.xlu0 %759 }
 0x219   :  { %v584_v46 = vmax.f32 %v558_v40, 0.0 }
 0x21a   :  { %v583_v47 = vmax.f32 %v553_v44, 0.0  ;;  %v978_v48 = vpop.f32.mrb[4].mxu1  ;;  %1085 = vmatprep.subr.bf16.mxu1 %v1084_v43  ;;  %v764_v36 = vsub.s32 0, %v763_v33 }
 0x21b   :  { %v568_v49 = vadd.f32 %v978_v48, %v464_v42  ;;  %v562_v50 = vpop.f32.mrb[5].mxu1  ;;  %1087 = vmatpush3.bf16.msra.mxu1 %v1084_v43 }
 0x21c   :  { %v1088_v51 = vpack.c.bf16 %v584_v46, %v583_v47  ;;  %v563_v52 = vadd.f32 %v562_v50, %v459_v45  ;;  %v765_v40 = vrot.slane %v760_v38, %v764_v36 }
 0x21d   :  { %v586_v53 = vmax.f32 %v568_v49, 0.0 }
 0x21e   :  { %v585_v55 = vmax.f32 %v563_v52, 0.0  ;;  %v981_v56 = vpop.f32.mrb[6].mxu1  ;;  %1089 = vmatprep.subr.bf16.mxu1 %v1088_v51 }
 0x21f   :  { %v578_v58 = vadd.f32 %v981_v56, %v474_v54  ;;  %v572_v59 = vpop.f32.mrb[7].mxu1  ;;  %1091 = vmatpush3.bf16.msra.mxu1 %v1088_v51 }
 0x220   :  { %v1092_v60 = vpack.c.bf16 %v586_v53, %v585_v55  ;;  %v573_v61 = vadd.f32 %v572_v59, %v469_v57 }
 0x221   :  { %v588_v62 = vmax.f32 %v578_v58, 0.0 }
 0x222   :  { %v587_v63 = vmax.f32 %v573_v61, 0.0  ;;  %1093 = vmatprep.subr.bf16.mxu1 %v1092_v60 }
 0x223   :  { %1095 = vmatpush3.bf16.msra.mxu1 %v1092_v60 }
 0x224   :  { %v1096_v0 = vpack.c.bf16 %v588_v62, %v587_v63 }
 0x226   :  { %1097 = vmatprep.subr.bf16.mxu1 %v1096_v0 }
 0x227   :  { %1099 = vmatpush3.bf16.msra.mxu1 %v1096_v0 }
 0x22a   :  { %999 = vmatmul.mubr.msk.f32.vlgmr.msra.gmra.mrb[8].mxu1 %vm617_vm2, %v590_v1 }
 0x22b   :  { %1001 = vmatprep.mubr.msk.f32.mxu1 %vm617_vm2, %v591_v2 }
 0x22e   :  { %1002 = vmatmul.mubr.msk.f32.gmra.mrb[10].mxu1 %vm617_vm2, %v592_v3 }
 0x2fd   :  { %v1000_v8 = vpop.f32.mrb[8].mxu1 }
 0x2fe   :  { %v702_v9 = vadd.f32 %v1000_v8, %v605_v5  ;;  %v696_v10 = vpop.f32.mrb[9].mxu1 }
 0x2ff   :  { %v697_v11 = vadd.f32 %v696_v10, %v600_v4 }
 0x300   :  { %v716_v13 = vmax.f32 %v702_v9, 0.0 }
 0x301   :  { %v715_v15 = vmax.f32 %v697_v11, 0.0  ;;  %v1003_v16 = vpop.f32.mrb[10].mxu1 }
 0x302   :  { %v744_v17 = vmul.f32 %v731_v14, %v716_v13  ;;  %v712_v18 = vadd.f32 %v1003_v16, %v615_v7  ;;  %v706_v19 = vpop.f32.mrb[11].mxu1 }
 0x303   :  { %v743_v20 = vmul.f32 %v726_v12, %v715_v15  ;;  %v707_v21 = vadd.f32 %v706_v19, %v610_v6 }
 0x304   :  { %v718_v23 = vmax.f32 %v712_v18, 0.0 }
 0x305   :  { %v747_v22 = vadd.f32 %v744_v17, %v743_v20  ;;  %v717_v24 = vmax.f32 %v707_v21, 0.0 }
 0x306   :  { %v746_v28 = vmul.f32 %v741_v27, %v718_v23 }
 0x307   :  { %v745_v26 = vmul.f32 %v736_v25, %v717_v24 }
 0x309   :  { %v748_v29 = vadd.f32 %v747_v22, %v745_v26 }
 0x30b   :  { %v749_v31 = vadd.f32 %v748_v29, %v746_v28 }
 0x30d   :  { %v750_v32 = vrot.slane %v749_v31, 4 }
 0x30f   :  { %v751_v34 = vadd.f32 %v750_v32, %v749_v31 }
 0x311   :  { %v752_v35 = vrot.slane %v751_v34, 2 }
 0x313   :  { %v753_v37 = vadd.f32 %v752_v35, %v751_v34 }
 0x315   :  { %v754_v39 = vrot.slane %v753_v37, 1 }
 0x317   :  { %v755_v41 = vadd.f32 %v754_v39, %v753_v37 }
 0x319   :  { %v766_v42 = vadd.f32 %v765_v40, %v755_v41 }
 0x31b   :  { %v767_v43 = vsub.f32 0.0, %v766_v42 }
 0x31d   :  { %v768_v44 = vmul.f32 1.442695, %v767_v43 }
 0x31f   :  { %1103 = vpow2.f32 %v768_v44 }
 0x329   :  { %v1104_v45 = vpop.eup %1103 }
 0x32a   :  { %v770_v46 = vadd.f32 1.0, %v1104_v45 }
 0x32c   :  { %1105 = vrcp.f32 %v770_v46 }
 0x336   :  { %v1106_v47 = vpop.eup %1105 }
 0x337   :  { %773 = vst [vmem:[%s1459_s9] sm:$0x1] %v1106_v47 }

</bundles_post_ra>
